<compile_context>
chip_gen: v7x
topology: tpu7x:2x2x1
jax: 0.10.0
libtpu: 0.0.40
codegen_flags: <defaults>
</compile_context>

<pallas_src>
import functools
import math

import jax
import jax.numpy as jnp
from jax.experimental import pallas as pl
from jax.experimental.pallas import tpu as pltpu


_TM_TARGET = 512        # row-tile target (multiple of 8)
_TD_CAP = 2048          # feature-tile upper bound (multiple of 128)


def _round_up(x, m):
    return ((x + m - 1) // m) * m


def _cdiv(a, b):
    return -(-a // b)


def _vmem_budget_bytes():
    """~75% of physical VMEM (capped at 100 MiB); conservative 48 MiB fallback."""
    cap = None
    try:
        cap = getattr(pltpu.get_tpu_info(), "vmem_capacity_bytes", None)
    except Exception:
        cap = None
    if not cap:
        cap = 64 * 1024 * 1024          # v7x per-TC worst case
    return min((int(cap) * 3) // 4, 100 * 1024 * 1024)


def _pick_tiles(N, D, in_bytes, mxu_bytes, budget, tm=None, td=None):
    """Pick (tm, td, n_pad, d_pad) under the VMEM budget."""
    n8 = _round_up(max(N, 1), 8)
    if tm is None:
        if n8 <= _TM_TARGET:
            # Prefer two even row tiles (v7x megacore) when it costs no padding.
            tm = n8 // 2 if (n8 >= 16 and n8 % 16 == 0) else n8
        else:
            ni = _cdiv(n8, _TM_TARGET)
            tm = _round_up(_cdiv(n8, ni), 8)
    assert tm % 8 == 0

    d128 = _round_up(max(D, 1), 128)
    if td is None:
        td = min(d128, _TD_CAP)

        def fits(t):
            # double-buffered x + h0 (native dtype) + f32 out tile + weight tile
            return 2 * (2 * tm * t * in_bytes + tm * t * 4 + t * t * mxu_bytes) \
                <= (budget * 9) // 10

        while td > 256 and not fits(td):
            td = max(256, _round_up(td // 2, 128))
        if td == 256 and not fits(td):
            td = 128                    # last resort
    assert td % 128 == 0

    n_pad = _round_up(N, tm)
    d_pad = _round_up(D, td)
    return tm, td, n_pad, d_pad


def _graph_chenn_kernel(x_ref, h0_ref, w_ref, out_ref, *, a1, a2, c1, c2):
    """Grid = (row tile i, out-col tile j, contraction tile k); k innermost.

    x_ref, h0_ref : (tm, td) native dtype -- column slice k of row tile i
    w_ref         : (td, td)              -- theta-scaled weight block [k, j]
    out_ref       : (tm, td) f32          -- output block [i, j], VMEM-resident
                                             across k (direct accumulator).
    """
    j = pl.program_id(1)
    k = pl.program_id(2)

    x = x_ref[...].astype(jnp.float32)
    h0 = h0_ref[...].astype(jnp.float32)
    support = a1 * x + a2 * h0                        # f32 blend on the VPU

    @pl.when(k == 0)
    def _init():
        out_ref[...] = jnp.zeros_like(out_ref)

    # MXU: narrow operands (bf16 by default), f32 accumulation into out_ref.
    mm = jnp.dot(support.astype(w_ref.dtype), w_ref[...],
                 preferred_element_type=jnp.float32)

    # The residual (c1*x + c2*h0) only touches output columns j.  Because the
    # (padded) weight is square and tn == tk, the x/h0 block loaded at k == j
    # is exactly that column slice, so the residual fuses into the same
    # read-modify-write as the matmul accumulate (no second out_ref pass).
    @pl.when(k == j)
    def _acc_with_residual():
        out_ref[...] += mm + (c1 * x + c2 * h0)

    @pl.when(k != j)
    def _acc():
        out_ref[...] += mm


def graph_chenn_forward(x, h0, weight, lamda, alpha, l, *,
                        tm=None, td=None, mxu_dtype=jnp.bfloat16):
    """x, h0: (N, D) f32 or bf16; weight: (D, D).  Returns (N, D) float32."""
    N, D = x.shape
    assert h0.shape == (N, D)
    assert weight.shape == (D, D), \
        "GraphChenn's fused residual requires in_features == out_features"

    alpha = float(alpha)
    theta = min(1.0, math.log(float(lamda) / float(l) + 1.0))  # python scalar (as torch)
    a1, a2 = 1.0 - alpha, alpha                       # support blend
    c1 = (1.0 - theta) * (1.0 - alpha) + 1.0          # residual coefficient on x
    c2 = (1.0 - theta) * alpha                        # residual coefficient on h0

    in_bytes = x.dtype.itemsize
    mxu_bytes = jnp.dtype(mxu_dtype).itemsize
    budget = _vmem_budget_bytes()
    tm, td, n_pad, d_pad = _pick_tiles(N, D, in_bytes, mxu_bytes, budget,
                                       tm=tm, td=td)
    ni, nj, nk = n_pad // tm, d_pad // td, d_pad // td

    # theta folded into the weight; scaled in f32 *before* any bf16 cast.
    w_scaled = (theta * weight.astype(jnp.float32)).astype(mxu_dtype)

    # Wrapper-side padding only when shapes are actually misaligned.
    if n_pad != N or d_pad != D:
        x_in = jnp.pad(x, ((0, n_pad - N), (0, d_pad - D)))
        h0_in = jnp.pad(h0, ((0, n_pad - N), (0, d_pad - D)))
    else:
        x_in, h0_in = x, h0
    w_in = jnp.pad(w_scaled, ((0, d_pad - D), (0, d_pad - D))) if d_pad != D else w_scaled

    kernel = functools.partial(_graph_chenn_kernel, a1=a1, a2=a2, c1=c1, c2=c2)

    out = pl.pallas_call(
        kernel,
        out_shape=jax.ShapeDtypeStruct((n_pad, d_pad), jnp.float32),
        grid_spec=pltpu.PrefetchScalarGridSpec(
            num_scalar_prefetch=0,
            grid=(ni, nj, nk),
            in_specs=[
                pl.BlockSpec((tm, td), lambda i, j, k: (i, k)),   # x  [row, contraction]
                pl.BlockSpec((tm, td), lambda i, j, k: (i, k)),   # h0 [row, contraction]
                pl.BlockSpec((td, td), lambda i, j, k: (k, j)),   # W' [contraction, out-col]
            ],
            out_specs=pl.BlockSpec((tm, td), lambda i, j, k: (i, j)),
        ),
        compiler_params=pltpu.CompilerParams(
            dimension_semantics=("parallel", "parallel", "arbitrary"),
            vmem_limit_bytes=budget,
        ),
    )(x_in, h0_in, w_in)

    if n_pad != N or d_pad != D:
        out = out[:N, :D]
    return out


def _reference(x, h0, weight, lamda, alpha, l):
    theta = min(1.0, math.log(float(lamda) / float(l) + 1.0))
    xf = x.astype(jnp.float32)
    hf = h0.astype(jnp.float32)
    wf = weight.astype(jnp.float32)
    support = (1.0 - alpha) * xf + alpha * hf
    return theta * (support @ wf) + (1.0 - theta) * support + xf


if __name__ == "__main__":
    lamda, alpha = 0.5, 0.1
    key = jax.random.PRNGKey(0)
    k1, k2, k3, k4, k5, k6, k7, k8, k9 = jax.random.split(key, 9)

    # ---- case 1: tiny module-consistent shapes (8 nodes x 32 feats), ragged D
    N, D, layer_idx = 8, 32, 1
    stdv = 1.0 / math.sqrt(D)
    x = jax.random.normal(k1, (N, D), dtype=jnp.float32)
    h0 = jax.random.normal(k2, (N, D), dtype=jnp.float32)
    w = jax.random.uniform(k3, (D, D), dtype=jnp.float32, minval=-stdv, maxval=stdv)

    ref = _reference(x, h0, w, lamda, alpha, layer_idx)

    out_f32 = jax.block_until_ready(
        graph_chenn_forward(x, h0, w, lamda, alpha, layer_idx,
                            mxu_dtype=jnp.float32))        # exact-semantics path
    assert out_f32.shape == (N, D)
    assert jnp.allclose(out_f32, ref, atol=1e-4, rtol=1e-4)

    out_bf16 = jax.block_until_ready(
        graph_chenn_forward(x, h0, w, lamda, alpha, layer_idx))  # default fast path
    assert out_bf16.shape == (N, D)
    assert jnp.allclose(out_bf16, ref, atol=3e-2, rtol=3e-2)

    # ---- case 2: force the multi-tile (row / out-col / contraction) grid ----
    N2, D2, layer_idx2 = 32, 160, 4
    stdv2 = 1.0 / math.sqrt(D2)
    x2 = jax.random.normal(k4, (N2, D2), dtype=jnp.float32)
    h02 = jax.random.normal(k5, (N2, D2), dtype=jnp.float32)
    w2 = jax.random.uniform(k6, (D2, D2), dtype=jnp.float32,
                            minval=-stdv2, maxval=stdv2)
    ref2 = _reference(x2, h02, w2, lamda, alpha, layer_idx2)
    out2 = jax.block_until_ready(
        graph_chenn_forward(x2, h02, w2, lamda, alpha, layer_idx2,
                            tm=8, td=128, mxu_dtype=jnp.float32))  # grid (4, 2, 2)
    assert out2.shape == (N2, D2)
    assert jnp.allclose(out2, ref2, atol=1e-4, rtol=1e-4)

    # ---- case 3: aligned no-pad fast path, bf16 inputs, two row tiles -------
    N3, D3, layer_idx3 = 64, 128, 2
    stdv3 = 1.0 / math.sqrt(D3)
    x3 = jax.random.normal(k7, (N3, D3), dtype=jnp.float32).astype(jnp.bfloat16)
    h03 = jax.random.normal(k8, (N3, D3), dtype=jnp.float32).astype(jnp.bfloat16)
    w3 = jax.random.uniform(k9, (D3, D3), dtype=jnp.float32,
                            minval=-stdv3, maxval=stdv3)
    ref3 = _reference(x3, h03, w3, lamda, alpha, layer_idx3)
    out3 = jax.block_until_ready(
        graph_chenn_forward(x3, h03, w3, lamda, alpha, layer_idx3))
    assert out3.shape == (N3, D3)
    assert out3.dtype == jnp.float32
    assert jnp.allclose(out3, ref3, atol=5e-2, rtol=5e-2)

    print("KERNEL_OK")
</pallas_src>

<mosaic_0001>
module attributes {stable_mosaic.version = 11 : i64} {
  func.func @_graph_chenn_kernel(%arg0: i32, %arg1: i32, %arg2: i32, %arg3: memref<8x128xf32, #tpu.memory_space<vmem>>, %arg4: memref<8x128xf32, #tpu.memory_space<vmem>>, %arg5: memref<128x128xf32, #tpu.memory_space<vmem>>, %arg6: memref<8x128xf32, #tpu.memory_space<vmem>>) attributes {dimension_semantics = [#tpu.dimension_semantics<parallel>, #tpu.dimension_semantics<parallel>, #tpu.dimension_semantics<arbitrary>], iteration_bounds = array<i64: 1, 1, 1>, scalar_prefetch = 0 : i64, scratch_operands = 0 : i64, tpu.core_type = #tpu.core_type<tc>, window_params = [{transform_indices = @transform_0, window_bounds = array<i64: 8, 128>}, {transform_indices = @transform_1, window_bounds = array<i64: 8, 128>}, {transform_indices = @transform_2, window_bounds = array<i64: 128, 128>}, {transform_indices = @transform_3, window_bounds = array<i64: 8, 128>}]} {
    %c0 = arith.constant 0 : index
    %c0_0 = arith.constant 0 : index
    %0 = vector.load %arg3[%c0, %c0_0] : memref<8x128xf32, #tpu.memory_space<vmem>>, vector<8x128xf32>
    %c0_1 = arith.constant 0 : index
    %c0_2 = arith.constant 0 : index
    %1 = vector.load %arg4[%c0_1, %c0_2] : memref<8x128xf32, #tpu.memory_space<vmem>>, vector<8x128xf32>
    %cst = arith.constant 0.899999976 : f32
    %2 = vector.broadcast %cst : f32 to vector<8x128xf32>
    %3 = arith.mulf %2, %0 : vector<8x128xf32>
    %cst_3 = arith.constant 1.000000e-01 : f32
    %4 = vector.broadcast %cst_3 : f32 to vector<8x128xf32>
    %5 = arith.mulf %4, %1 : vector<8x128xf32>
    %6 = arith.addf %3, %5 : vector<8x128xf32>
    %c0_i32 = arith.constant 0 : i32
    %7 = arith.cmpi eq, %arg2, %c0_i32 : i32
    %8 = arith.extui %7 : i1 to i32
    %c0_i32_4 = arith.constant 0 : i32
    %9 = arith.cmpi ne, %8, %c0_i32_4 : i32
    scf.if %9 {
      %cst_10 = arith.constant 0.000000e+00 : f32
      %18 = vector.broadcast %cst_10 : f32 to vector<8x128xf32>
      %c0_11 = arith.constant 0 : index
      %c0_12 = arith.constant 0 : index
      %19 = vector.load %arg6[%c0_11, %c0_12] : memref<8x128xf32, #tpu.memory_space<vmem>>, vector<8x128xf32>
      tpu.vector_store %arg6[%c0_11, %c0_12], %18 {strides = array<i32>} : memref<8x128xf32, #tpu.memory_space<vmem>>, vector<8x128xf32>,
    } else {
    }
    %c0_5 = arith.constant 0 : index
    %c0_6 = arith.constant 0 : index
    %10 = vector.load %arg5[%c0_5, %c0_6] : memref<128x128xf32, #tpu.memory_space<vmem>>, vector<128x128xf32>
    %cst_7 = arith.constant dense<0.000000e+00> : vector<8x128xf32>
    %11 = tpu.matmul %6, %10, %cst_7 {dimension_numbers = #tpu.dot_dimension_numbers<[1], [0], [0], [1], [0, 0, 1, 1], [], []>} : vector<8x128xf32>, vector<128x128xf32>, vector<8x128xf32> -> vector<8x128xf32>
    %12 = arith.cmpi eq, %arg2, %arg1 : i32
    %13 = arith.extui %12 : i1 to i32
    %c0_i32_8 = arith.constant 0 : i32
    %14 = arith.cmpi ne, %13, %c0_i32_8 : i32
    scf.if %14 {
      %c0_10 = arith.constant 0 : index
      %c0_11 = arith.constant 0 : index
      %18 = vector.load %arg6[%c0_10, %c0_11] : memref<8x128xf32, #tpu.memory_space<vmem>>, vector<8x128xf32>
      %cst_12 = arith.constant 1.53508139 : f32
      %19 = vector.broadcast %cst_12 : f32 to vector<8x128xf32>
      %20 = arith.mulf %19, %0 : vector<8x128xf32>
      %cst_13 = arith.constant 0.0594534874 : f32
      %21 = vector.broadcast %cst_13 : f32 to vector<8x128xf32>
      %22 = arith.mulf %21, %1 : vector<8x128xf32>
      %23 = arith.addf %20, %22 : vector<8x128xf32>
      %24 = arith.addf %11, %23 : vector<8x128xf32>
      %25 = arith.addf %18, %24 : vector<8x128xf32>
      %c0_14 = arith.constant 0 : index
      %c0_15 = arith.constant 0 : index
      %26 = vector.load %arg6[%c0_14, %c0_15] : memref<8x128xf32, #tpu.memory_space<vmem>>, vector<8x128xf32>
      tpu.vector_store %arg6[%c0_14, %c0_15], %25 {strides = array<i32>} : memref<8x128xf32, #tpu.memory_space<vmem>>, vector<8x128xf32>,
    } else {
    }
    %15 = arith.cmpi ne, %arg2, %arg1 : i32
    %16 = arith.extui %15 : i1 to i32
    %c0_i32_9 = arith.constant 0 : i32
    %17 = arith.cmpi ne, %16, %c0_i32_9 : i32
    scf.if %17 {
      %c0_10 = arith.constant 0 : index
      %c0_11 = arith.constant 0 : index
      %18 = vector.load %arg6[%c0_10, %c0_11] : memref<8x128xf32, #tpu.memory_space<vmem>>, vector<8x128xf32>
      %19 = arith.addf %18, %11 : vector<8x128xf32>
      %c0_12 = arith.constant 0 : index
      %c0_13 = arith.constant 0 : index
      %20 = vector.load %arg6[%c0_12, %c0_13] : memref<8x128xf32, #tpu.memory_space<vmem>>, vector<8x128xf32>
      tpu.vector_store %arg6[%c0_12, %c0_13], %19 {strides = array<i32>} : memref<8x128xf32, #tpu.memory_space<vmem>>, vector<8x128xf32>,
    } else {
    }
    return
  }
  func.func @transform_0(%arg0: i32, %arg1: i32, %arg2: i32) -> (i32, i32) {
    %c0_i32 = arith.constant 0 : i32
    return %arg0, %arg2 : i32, i32
  }
  func.func @transform_1(%arg0: i32, %arg1: i32, %arg2: i32) -> (i32, i32) {
    %c0_i32 = arith.constant 0 : i32
    return %arg0, %arg2 : i32, i32
  }
  func.func @transform_2(%arg0: i32, %arg1: i32, %arg2: i32) -> (i32, i32) {
    %c0_i32 = arith.constant 0 : i32
    return %arg2, %arg1 : i32, i32
  }
  func.func @transform_3(%arg0: i32, %arg1: i32, %arg2: i32) -> (i32, i32) {
    %c0_i32 = arith.constant 0 : i32
    return %arg0, %arg1 : i32, i32
  }
}

</mosaic_0001>

<bundles_post_ra>
// kernel: tpu_custom_call.1
= control target key start
LH: loop header
LB: loop body
LE: loop exit
PB: predicated region body
PF: predicated region fallthrough
CT: control target
= control target key end

     0   :  { %8 = vsyncpa [#allocation3], 0  ;;  %s438_s0 = inlined_call_operand.hbm [shape: f32[8,128], index: 0, kind: input, shape index: {}]   ;;  %s439_s1 = inlined_call_operand.hbm [shape: f32[8,128], index: 1, kind: input, shape index: {}]   ;;  %s440_s2 = inlined_call_operand.hbm [shape: f32[128,128], index: 2, kind: input, shape index: {}]   ;;  %s441_s3 = inlined_call_operand.hbm [shape: f32[8,128], index: 3, kind: output, shape index: {}]  }
   0x1   :  { %9 = vsyncpa [#allocation6], 0 }
   0x2   :  { %10 = vsyncpa [#allocation4], 0  ;;  %s361_s12 = smov [#allocation5]   ;;  %s362_s14 = smov [#allocation2]  }
   0x3   :  { %s27_s13 = sshll.u32 %s361_s12, 4  ;;  %s17_s15 = sshll.u32 %s362_s14, 4  ;;  %s28_s13 = int_to_ptr.vmem [resolvable:$true] %s27_s13  ;;  %s18_s15 = int_to_ptr.vmem [resolvable:$true] %s17_s15 }
   0x4   :  { %s267_s18 = scalar_lea.hbm %s439_s1, 128 }
   0x5   :  { %p268_p0 = scmp.ne.s32.totalorder %s439_s1, %s267_s18  ;;  %p271_p1 = scmp.lt.u32.totalorder %s267_s18, %s439_s1 }
   0x7   :  { %p273_p2 = pnand %p271_p1, %p268_p0 }
   0x9   :  { %276 = shalt.err (!%p273_p2)
}
   0xa   :  { %s277_s23 = scalar_lea.vmem %s28_s13, 128  ;;  %p282_p4 = scmp.lt.s32.totalorder %s28_s13, %s28_s13 }
   0xb   :  { %p278_p3 = scmp.ne.s32.totalorder %s28_s13, %s277_s23  ;;  %p283_p5 = scmp.lt.s32.totalorder %s277_s23, %s277_s23 }
   0xd   :  { %p284_p6 = por %p283_p5, %p282_p4 }
   0xf   :  { %p285_p7 = pnand %p284_p6, %p278_p3 }
  0x11   :  { %288 = shalt.err (!%p285_p7)
}
  0x12   :  { %30 = dma.hbm_to_vmem [thread:$0]  %s439_s1, 128, %s28_s13, [#allocation6]  }
  0x13   :  { %s289_s28 = scalar_lea.hbm %s438_s0, 128 }
  0x14   :  { %p290_p8 = scmp.ne.s32.totalorder %s438_s0, %s289_s28  ;;  %p293_p9 = scmp.lt.u32.totalorder %s289_s28, %s438_s0 }
  0x16   :  { %p295_p10 = pnand %p293_p9, %p290_p8 }
  0x18   :  { %298 = shalt.err (!%p295_p10)
}
  0x19   :  { %s299_s6 = scalar_lea.vmem %s18_s15, 128  ;;  %p304_p12 = scmp.lt.s32.totalorder %s18_s15, %s18_s15 }
  0x1a   :  { %p300_p11 = scmp.ne.s32.totalorder %s18_s15, %s299_s6  ;;  %p305_p13 = scmp.lt.s32.totalorder %s299_s6, %s299_s6 }
  0x1c   :  { %p306_p0 = por %p305_p13, %p304_p12 }
  0x1e   :  { %p307_p1 = pnand %p306_p0, %p300_p11 }
  0x20   :  { %310 = shalt.err (!%p307_p1)
}
  0x21   :  { %20 = dma.hbm_to_vmem [thread:$0]  %s438_s0, 128, %s18_s15, [#allocation3]  }
  0x22   :  { %s363_s8 = smov [#allocation7]   ;;  %s311_s12 = scalar_lea.hbm %s440_s2, 2048 }
  0x23   :  { %s36_s9 = sshll.u32 %s363_s8, 4  ;;  %p312_p2 = scmp.ne.s32.totalorder %s440_s2, %s311_s12  ;;  %s37_s9 = int_to_ptr.vmem [resolvable:$true] %s36_s9 }
  0x24   :  { %p315_p3 = scmp.lt.u32.totalorder %s311_s12, %s440_s2 }
  0x26   :  { %p317_p4 = pnand %p315_p3, %p312_p2 }
  0x28   :  { %320 = shalt.err (!%p317_p4)
}
  0x29   :  { %s321_s18 = scalar_lea.vmem %s37_s9, 2048  ;;  %p326_p6 = scmp.lt.s32.totalorder %s37_s9, %s37_s9 }
  0x2a   :  { %p322_p5 = scmp.ne.s32.totalorder %s37_s9, %s321_s18  ;;  %p327_p7 = scmp.lt.s32.totalorder %s321_s18, %s321_s18 }
  0x2c   :  { %p328_p8 = por %p327_p7, %p326_p6 }
  0x2e   :  { %p329_p9 = pnand %p328_p8, %p322_p5 }
  0x30   :  { %332 = shalt.err (!%p329_p9)
}
  0x31   :  { %s364_s0 = smov 128   ;;  %s365_s15 = smov 8  }
  0x32   :  { %42 = dma.hbm_to_vmem [thread:$0]  %s440_s2, 2048, %s37_s9, [#allocation6], %s364_s0, %s364_s0, %s365_s15  }
  0x33   :  { %355 = dma.done.wait [#allocation3], 128  }
  0x34   :  { %356 = vsyncadd [#allocation3], 4294967168 }
  0x35   :  { %357 = dma.done.wait [#allocation6], 2176  }
  0x36   :  { %358 = vsyncadd [#allocation6], 4294965120  ;;  %v366_v0 = vmov 0.0|0.0   ;;  %vm367_vm0 = vmmov 0   ;;  %v368_v1 = vmov 0.0   ;;  %v62_v2 = vld [vmem:[#allocation7] sm:$0xff] }
  0x37   :  { %234 = vmatprep.subr.bf16.mxu0 %v366_v0  ;;  %231 = vmatprep.mubr.msk.f32.mxu0 %vm367_vm0, %v368_v1  ;;  %v63_v3 = vld [vmem:[#allocation7 + $0x8] sm:$0xff]  ;;  %v64_v4 = vld [vmem:[#allocation7 + $0x10] sm:$0xff]  ;;  %v65_v6 = vld [vmem:[#allocation7 + $0x18] sm:$0xff]  ;;  %s369_s2 = smov [#allocation8]  }
  0x38   :  { %v235_v5 = vpack.c.bf16 %v63_v3, %v62_v2  ;;  %v238_v7 = vpack.c.bf16 %v65_v6, %v64_v4  ;;  %v66_v8 = vld [vmem:[#allocation7 + $0x20] sm:$0xff]  ;;  %v67_v9 = vld [vmem:[#allocation7 + $0x28] sm:$0xff]  ;;  %v68_v11 = vld [vmem:[#allocation7 + $0x30] sm:$0xff]  ;;  %s172_s21 = sshll.u32 %s369_s2, 4  ;;  %s173_s21 = int_to_ptr.vmem [resolvable:$true] %s172_s21 }
  0x39   :  { %v241_v10 = vpack.c.bf16 %v67_v9, %v66_v8  ;;  %v69_v12 = vld [vmem:[#allocation7 + $0x38] sm:$0xff]  ;;  %v70_v14 = vld [vmem:[#allocation7 + $0x40] sm:$0xff]  ;;  %v71_v15 = vld [vmem:[#allocation7 + $0x48] sm:$0xff]  ;;  %s333_s22 = scalar_lea.vmem %s173_s21, 128  ;;  %p338_p11 = scmp.lt.s32.totalorder %s173_s21, %s173_s21 }
  0x3a   :  { %236 = vmatpush3.bf16.msra.mxu0 %v235_v5  ;;  %v244_v13 = vpack.c.bf16 %v69_v12, %v68_v11  ;;  %v247_v16 = vpack.c.bf16 %v71_v15, %v70_v14  ;;  %v72_v17 = vld [vmem:[#allocation7 + $0x50] sm:$0xff]  ;;  %v73_v18 = vld [vmem:[#allocation7 + $0x58] sm:$0xff]  ;;  %v74_v20 = vld [vmem:[#allocation7 + $0x60] sm:$0xff]  ;;  %p334_p10 = scmp.ne.s32.totalorder %s173_s21, %s333_s22  ;;  %p339_p12 = scmp.lt.s32.totalorder %s333_s22, %s333_s22 }
  0x3b   :  { %237 = vmatprep.subr.bf16.mxu0 %v366_v0  ;;  %v250_v19 = vpack.c.bf16 %v73_v18, %v72_v17  ;;  %v75_v21 = vld [vmem:[#allocation7 + $0x68] sm:$0xff]  ;;  %v52_v23 = vld [vmem:[#allocation2] sm:$0xff]  ;;  %v53_v24 = vld [vmem:[#allocation5] sm:$0xff] }
  0x3c   :  { %v253_v22 = vpack.c.bf16 %v75_v21, %v74_v20  ;;  %v76_v25 = vld [vmem:[#allocation7 + $0x70] sm:$0xff]  ;;  %v77_v26 = vld [vmem:[#allocation7 + $0x78] sm:$0xff]  ;;  %v54_v27 = vmul.f32 0.9, %v52_v23  ;;  %v55_v28 = vmul.f32 0.1, %v53_v24  ;;  %p340_p13 = por %p339_p12, %p338_p11 }
  0x3d   :  { %v256_v29 = vpack.c.bf16 %v77_v26, %v76_v25  ;;  %v153_v31 = vmul.f32 1.5350814, %v52_v23  ;;  %v154_v32 = vmul.f32 0.059453487, %v53_v24 }
  0x3e   :  { %239 = vmatpush3.bf16.msra.mxu0 %v238_v7  ;;  %v56_v30 = vadd.f32 %v55_v28, %v54_v27  ;;  %p341_p0 = pnand %p340_p13, %p334_p10 }
  0x3f   :  { %240 = vmatprep.subr.bf16.mxu0 %v366_v0  ;;  %v155_v33 = vadd.f32 %v154_v32, %v153_v31 }
  0x42   :  { %242 = vmatpush3.bf16.msra.mxu0 %v241_v10 }
  0x43   :  { %243 = vmatprep.subr.bf16.mxu0 %v366_v0 }
  0x46   :  { %245 = vmatpush3.bf16.msra.mxu0 %v244_v13 }
  0x47   :  { %246 = vmatprep.subr.bf16.mxu0 %v366_v0 }
  0x4a   :  { %248 = vmatpush3.bf16.msra.mxu0 %v247_v16 }
  0x4b   :  { %249 = vmatprep.subr.bf16.mxu0 %v366_v0 }
  0x4e   :  { %251 = vmatpush3.bf16.msra.mxu0 %v250_v19 }
  0x4f   :  { %252 = vmatprep.subr.bf16.mxu0 %v366_v0 }
  0x52   :  { %254 = vmatpush3.bf16.msra.mxu0 %v253_v22 }
  0x53   :  { %255 = vmatprep.subr.bf16.mxu0 %v366_v0 }
  0x56   :  { %257 = vmatpush3.bf16.msra.mxu0 %v256_v29 }
  0x59   :  { %232 = vmatmul.mubr.f32.vlgmr.msra.gmra.mrb[0].mxu0 %v56_v30 }
 0x12c   :  { %v144_v34 = vpop.f32.mrb[0].mxu0 }
 0x12d   :  { %v156_v35 = vadd.f32 %v155_v33, %v144_v34  ;;  %v233_v36 = vpop.f32.mrb[1].mxu0 }
 0x12f   :  { %158 = vst [vmem:[#allocation8] sm:$0xff] %v156_v35 }
 0x130   :  { %344 = shalt.err (!%p341_p0)
}
 0x131   :  { %s345_s25 = scalar_lea.hbm %s441_s3, 128 }
 0x132   :  { %p346_p1 = scmp.ne.s32.totalorder %s441_s3, %s345_s25  ;;  %p349_p2 = scmp.lt.u32.totalorder %s345_s25, %s441_s3 }
 0x134   :  { %p351_p3 = pnand %p349_p2, %p346_p1 }
 0x136   :  { %354 = shalt.err (!%p351_p3)
}
 0x137   :  { %175 = dma.vmem_to_hbm [thread:$0]  %s173_s21, 128, %s441_s3, [#allocation4]  }
 0x138   :  { %359 = dma.done.wait [#allocation4], 128  }
 0x139   :  { %360 = vsyncadd [#allocation4], 4294967168 }
 0x13a   :  { %179 = vsyncpa [#allocation3], 1 }
 0x13b   :  { %180 = vsyncpa [#allocation6], 1 }
 0x13c   :  { %181 = vsyncpa [#allocation4], 1 }

</bundles_post_ra>
